<compile_context>
chip_gen: v5e
topology: v5e:2x2
jax: 0.10.0
libtpu: 0.0.40
codegen_flags: <defaults>
</compile_context>

<pallas_src>
import jax
import jax.numpy as jnp
from jax.experimental import pallas as pl
from jax.experimental.pallas import tpu as pltpu


def _round_up(x, m):
    return (x + m - 1) // m * m


def _choose_tile_batch(bs, tile_batch):
    """Pick a sublane-aligned batch tile.

    Rules:
      * never exceed `tile_batch` (VMEM cap; default 4096 keeps the pipeline
        buffers + temporaries under ~12 MiB, safe on v5e/v6e/v7x with the
        32 MiB vmem limit we request),
      * if the whole batch fits one tile but is large, split into >= 2 tiles
        so both v7x TensorCores get work,
      * tiles are either a multiple of 8 rows or exactly the full batch
        (both satisfy the (8, 128) block-shape rule).
    """
    cap = max(8, (int(tile_batch) // 8) * 8)
    if bs <= cap:
        if bs >= 2048:
            half = _round_up(pl.cdiv(bs, 2), 8)
            return min(cap, half)
        return bs                      # single tile, block == full array dims
    return cap


def _mean_risk_kernel(gamma_ref, atoms_ref, curr_ref, next_ref, aux_ref, o_ref):
    f32 = jnp.float32
    gamma = gamma_ref[0, 0]                       # scalar from SMEM
    atoms = atoms_ref[...].astype(f32)            # (1, A)
    curr = curr_ref[...].astype(f32)              # (TB, A)  upcast in-VMEM
    nxt = next_ref[...].astype(f32)               # (TB, A)
    aux = aux_ref[...].astype(f32)                # (TB, 2): [cost, not_done]
    cost = aux[:, 0:1]                            # (TB, 1)
    not_done = aux[:, 1:2]                        # (TB, 1)

    # Fused form: td = cost + sum_a( atoms * (gamma*not_done*next - curr) )
    # -> one VPU pass over the (TB, A) tile + a single cross-lane reduce.
    diff = gamma * not_done * nxt - curr          # (TB, A)
    o_ref[...] = cost + jnp.sum(diff * atoms, axis=1, keepdims=True)


def mean_risk(atom_values, curr_atom_probs, next_atom_probs, cost, not_done,
              threshold, curr_return, *, discount_factor, tile_batch=4096):
    """JAX/Pallas equivalent of MeanRisk.forward.

    threshold / curr_return are shape-validated but unused, exactly as in the
    PyTorch reference.
    """
    bs, num_atoms = curr_atom_probs.shape
    assert atom_values.shape == (num_atoms,)
    assert next_atom_probs.shape == (bs, num_atoms)
    assert cost.shape == (bs, 1)
    assert not_done.shape == (bs, 1)
    assert threshold.shape == (bs, 1)
    assert curr_return.shape == (bs, 1)

    tb = _choose_tile_batch(bs, tile_batch)
    num_tiles = pl.cdiv(bs, tb)                   # ragged last tile, no padding

    atoms_2d = atom_values.reshape(1, num_atoms)
    # Pack the two per-row scalars into one (bs, 2) input -> one small DMA.
    aux = jnp.concatenate(
        [cost.astype(jnp.float32), not_done.astype(jnp.float32)], axis=1)
    # Runtime scalar (SMEM) so different gammas do not force a recompile.
    gamma = jnp.asarray(discount_factor, jnp.float32).reshape(1, 1)

    out = pl.pallas_call(
        _mean_risk_kernel,
        out_shape=jax.ShapeDtypeStruct((bs, 1), jnp.float32),
        grid=(num_tiles,),
        in_specs=[
            pl.BlockSpec(memory_space=pltpu.MemorySpace.SMEM),      # gamma
            pl.BlockSpec((1, num_atoms), lambda i: (0, 0)),          # atoms
            pl.BlockSpec((tb, num_atoms), lambda i: (i, 0)),         # curr
            pl.BlockSpec((tb, num_atoms), lambda i: (i, 0)),         # next
            pl.BlockSpec((tb, 2), lambda i: (i, 0)),                 # aux
        ],
        out_specs=pl.BlockSpec((tb, 1), lambda i: (i, 0)),
        compiler_params=pltpu.CompilerParams(
            dimension_semantics=("parallel",),
            vmem_limit_bytes=32 * 1024 * 1024),
    )(gamma, atoms_2d, curr_atom_probs, next_atom_probs, aux)

    return out
    # TODO(synk): fuse this op into the producer softmax kernel (or at least
    # accept bf16 probs from it) -- its entire cost is re-reading what the
    # producer just wrote.
    # TODO(synk): if the producer can emit (num_atoms, bs) transposed probs,
    # switch to batch-on-lanes blocks ((A, tb) tiles, lane-dense (1, tb)
    # output) to fix the 204-byte-row DMA inefficiency; transposing here in
    # the wrapper would itself cost a full extra HBM pass.


def _mean_risk_ref(atom_values, curr, nxt, cost, not_done, discount_factor):
    curr_exp = jnp.sum(atom_values[None, :] * curr, axis=1, keepdims=True)
    next_exp = jnp.sum(atom_values[None, :] * nxt, axis=1, keepdims=True)
    return cost + discount_factor * not_done * next_exp - curr_exp


if __name__ == "__main__":
    key = jax.random.PRNGKey(0)
    discount_factor = 0.99

    def make_case(k, bs, num_atoms):
        ks = jax.random.split(k, 6)
        atom_values = jnp.linspace(-10.0, 10.0, num_atoms, dtype=jnp.float32)
        curr = jax.nn.softmax(
            jax.random.normal(ks[0], (bs, num_atoms), jnp.float32), axis=1)
        nxt = jax.nn.softmax(
            jax.random.normal(ks[1], (bs, num_atoms), jnp.float32), axis=1)
        cost = jax.random.uniform(ks[2], (bs, 1), dtype=jnp.float32)
        not_done = (jax.random.uniform(ks[3], (bs, 1)) > 0.1).astype(jnp.float32)
        threshold = jax.random.uniform(ks[4], (bs, 1), dtype=jnp.float32)
        curr_return = jax.random.uniform(ks[5], (bs, 1), dtype=jnp.float32)
        return atom_values, curr, nxt, cost, not_done, threshold, curr_return

    k1, k2 = jax.random.split(key)

    # Case 1: small C51-style problem -- single full-array tile.
    args = make_case(k1, bs=8, num_atoms=51)
    out = jax.block_until_ready(
        mean_risk(*args, discount_factor=discount_factor))
    ref = _mean_risk_ref(args[0], args[1], args[2], args[3], args[4],
                         discount_factor)
    assert out.shape == (8, 1)
    assert jnp.allclose(out, ref, atol=1e-4), (out, ref)

    # Case 2: batch not a tile multiple -- multi-tile parallel grid with a
    # ragged last block (no wrapper-side padding / slicing).
    args = make_case(k2, bs=300, num_atoms=51)
    out = jax.block_until_ready(
        mean_risk(*args, discount_factor=discount_factor, tile_batch=128))
    ref = _mean_risk_ref(args[0], args[1], args[2], args[3], args[4],
                         discount_factor)
    assert out.shape == (300, 1)
    assert jnp.allclose(out, ref, atol=1e-4), (out, ref)

    print("KERNEL_OK")
</pallas_src>

<mosaic_0001>
module attributes {stable_mosaic.version = 11 : i64} {
  func.func @_mean_risk_kernel(%arg0: i32, %arg1: memref<1x1xf32, #tpu.memory_space<smem>>, %arg2: memref<1x51xf32, #tpu.memory_space<vmem>>, %arg3: memref<8x51xf32, #tpu.memory_space<vmem>>, %arg4: memref<8x51xf32, #tpu.memory_space<vmem>>, %arg5: memref<8x2xf32, #tpu.memory_space<vmem>>, %arg6: memref<8x1xf32, #tpu.memory_space<vmem>>) attributes {dimension_semantics = [#tpu.dimension_semantics<parallel>], iteration_bounds = array<i64: 1>, scalar_prefetch = 0 : i64, scratch_operands = 0 : i64, tpu.core_type = #tpu.core_type<tc>, window_params = [{transform_indices = @transform_0, window_bounds = array<i64: 1, 1>}, {pipeline_mode = #tpu.pipeline_mode<synchronous>, transform_indices = @transform_1, window_bounds = array<i64: 1, 51>}, {transform_indices = @transform_2, window_bounds = array<i64: 8, 51>}, {transform_indices = @transform_3, window_bounds = array<i64: 8, 51>}, {transform_indices = @transform_4, window_bounds = array<i64: 8, 2>}, {transform_indices = @transform_5, window_bounds = array<i64: 8, 1>}]} {
    %c0 = arith.constant 0 : index
    %c0_0 = arith.constant 0 : index
    %0 = memref.load %arg1[%c0, %c0_0] : memref<1x1xf32, #tpu.memory_space<smem>>
    %c0_1 = arith.constant 0 : index
    %c0_2 = arith.constant 0 : index
    %1 = vector.load %arg2[%c0_1, %c0_2] : memref<1x51xf32, #tpu.memory_space<vmem>>, vector<1x51xf32>
    %c0_3 = arith.constant 0 : index
    %c0_4 = arith.constant 0 : index
    %2 = vector.load %arg3[%c0_3, %c0_4] : memref<8x51xf32, #tpu.memory_space<vmem>>, vector<8x51xf32>
    %c0_5 = arith.constant 0 : index
    %c0_6 = arith.constant 0 : index
    %3 = vector.load %arg4[%c0_5, %c0_6] : memref<8x51xf32, #tpu.memory_space<vmem>>, vector<8x51xf32>
    %c0_7 = arith.constant 0 : index
    %c0_8 = arith.constant 0 : index
    %4 = vector.load %arg5[%c0_7, %c0_8] : memref<8x2xf32, #tpu.memory_space<vmem>>, vector<8x2xf32>
    %5 = vector.extract_strided_slice %4 {offsets = [0, 0], sizes = [8, 1], strides = [1, 1]} : vector<8x2xf32> to vector<8x1xf32>
    %6 = vector.extract_strided_slice %4 {offsets = [0, 1], sizes = [8, 1], strides = [1, 1]} : vector<8x2xf32> to vector<8x1xf32>
    %7 = vector.broadcast %0 : f32 to vector<8x1xf32>
    %8 = arith.mulf %7, %6 : vector<8x1xf32>
    %9 = vector.broadcast %8 : vector<8x1xf32> to vector<8x51xf32>
    %10 = arith.mulf %9, %3 : vector<8x51xf32>
    %11 = arith.subf %10, %2 : vector<8x51xf32>
    %12 = vector.broadcast %1 : vector<1x51xf32> to vector<8x51xf32>
    %13 = arith.mulf %11, %12 : vector<8x51xf32>
    %cst = arith.constant dense<0.000000e+00> : vector<8xf32>
    %14 = vector.multi_reduction <add>, %13, %cst [1] : vector<8x51xf32> to vector<8xf32>
    %15 = vector.shape_cast %14 : vector<8xf32> to vector<8x1xf32>
    %16 = arith.addf %5, %15 : vector<8x1xf32>
    %c0_9 = arith.constant 0 : index
    %c0_10 = arith.constant 0 : index
    %17 = vector.load %arg6[%c0_9, %c0_10] : memref<8x1xf32, #tpu.memory_space<vmem>>, vector<8x1xf32>
    tpu.vector_store %arg6[%c0_9, %c0_10], %16 {strides = array<i32>} : memref<8x1xf32, #tpu.memory_space<vmem>>, vector<8x1xf32>,
    return
  }
  func.func @transform_0(%arg0: i32) -> (i32, i32) {
    %c0_i32 = arith.constant 0 : i32
    %c0_i32_0 = arith.constant 0 : i32
    %c0_i32_1 = arith.constant 0 : i32
    return %c0_i32, %c0_i32_0 : i32, i32
  }
  func.func @transform_1(%arg0: i32) -> (i32, i32) {
    %c0_i32 = arith.constant 0 : i32
    %c0_i32_0 = arith.constant 0 : i32
    %c0_i32_1 = arith.constant 0 : i32
    return %c0_i32, %c0_i32_0 : i32, i32
  }
  func.func @transform_2(%arg0: i32) -> (i32, i32) {
    %c0_i32 = arith.constant 0 : i32
    %c0_i32_0 = arith.constant 0 : i32
    return %arg0, %c0_i32 : i32, i32
  }
  func.func @transform_3(%arg0: i32) -> (i32, i32) {
    %c0_i32 = arith.constant 0 : i32
    %c0_i32_0 = arith.constant 0 : i32
    return %arg0, %c0_i32 : i32, i32
  }
  func.func @transform_4(%arg0: i32) -> (i32, i32) {
    %c0_i32 = arith.constant 0 : i32
    %c0_i32_0 = arith.constant 0 : i32
    return %arg0, %c0_i32 : i32, i32
  }
  func.func @transform_5(%arg0: i32) -> (i32, i32) {
    %c0_i32 = arith.constant 0 : i32
    %c0_i32_0 = arith.constant 0 : i32
    return %arg0, %c0_i32 : i32, i32
  }
}

</mosaic_0001>

<bundles_post_ra>
// kernel: tpu_custom_call.1
= control target key start
LH: loop header
LB: loop body
LE: loop exit
PB: predicated region body
PF: predicated region fallthrough
CT: control target
= control target key end

     0   :  { %11 = vsyncpa [#allocation4], 0  ;;  %s95_s21 = smov [#allocation3]   ;;  %s145_s0 = inlined_call_operand.<no memory space> [shape: f32[1,1], index: 0, kind: input, shape index: {}]   ;;  %s146_s1 = inlined_call_operand.vmem [shape: f32[1,51], index: 1, kind: input, shape index: {}]   ;;  %s147_s2 = inlined_call_operand.vmem [shape: f32[8,51], index: 2, kind: input, shape index: {}]   ;;  %s148_s3 = inlined_call_operand.hbm [shape: f32[8,51], index: 3, kind: input, shape index: {}]   ;;  %s149_s4 = inlined_call_operand.vmem [shape: f32[8,2], index: 4, kind: input, shape index: {}]   ;;  %s150_s5 = inlined_call_operand.vmem [shape: f32[8,1], index: 5, kind: output, shape index: {}]  }
   0x1   :  { %s23_s20 = sshll.u32 %s148_s3, 4  ;;  %s25_s22 = sshll.u32 %s95_s21, 4  ;;  %s24_s20 = int_to_ptr.hbm [resolvable:$true] %s23_s20  ;;  %s26_s22 = int_to_ptr.vmem [resolvable:$true] %s25_s22 }
   0x2   :  { %28 = dma.hbm_to_vmem [thread:$0]  %s24_s20, 128, %s26_s22, [#allocation4]  }
   0x3   :  { %93 = dma.done.wait [#allocation4], 128  }
   0x4   :  { %94 = vsyncadd [#allocation4], 4294967168  ;;  %v96_v0 = vmov 1   ;;  %v40_v1 = vstv %s145_s0  ;;  %v39_v2 = vld [vmem:[%s149_s4] sm:$0xff]  ;;  %vm53_vm0 = vcmask 416768   ;;  %vm58_vm1 = vcmask 7168  }
   0x5   :  { %67 = vset.pattern.permute.xlu0 %v96_v0  ;;  %v41_v3 = vmul.f32 %v40_v1, %v39_v2  ;;  %v38_v4 = vld [vmem:[#allocation3] sm:$0xff] }
   0x6   :  { %v37_v6 = vld [vmem:[%s147_s2] sm:$0xff] }
   0x7   :  { %44 = vperm.xlu0 %67, %v41_v3   ;;  %v68_v8 = vld [vmem:[%s146_s1] ss:$0 sm:$0xff] }
  0x79   :  { %v45_v5 = vpop.permute.xlu0 %44 }
  0x7a   :  { %v47_v7 = vmul.f32 %v45_v5, %v38_v4 }
  0x7c   :  { %v48_v9 = vsub.f32 %v47_v7, %v37_v6 }
  0x7e   :  { %v52_v10 = vmul.f32 %v68_v8, %v48_v9 }
  0x80   :  { %v54_v11 = vsel %vm53_vm0, %v52_v10, 0.0 }
  0x81   :  { %55 = vadd.xlane.f32.xlu0 %v54_v11 }
  0xf4   :  { %v56_v12 = vpop.xlane.xlu0 %55 }
  0xf5   :  { %v57_v13 = vadd.f32 %v56_v12, %v39_v2 }
  0xf7   :  { %59 = vst.msk [vmem:[%s150_s5] sm:$0xff] %vm58_vm1, %v57_v13 }
  0xf8   :  { %64 = vsyncpa [#allocation4], 1 }

</bundles_post_ra>
